<compile_context>
chip_gen: v5e
topology: v5e:2x2
jax: 0.10.0
libtpu: 0.0.40
codegen_flags: <defaults>
</compile_context>

<pallas_src>
import functools
import math

import jax
import jax.numpy as jnp
from jax import lax
from jax.experimental import pallas as pl
from jax.experimental.pallas import tpu as pltpu


def _num_tensorcores():
    """Best-effort TensorCores-per-chip (2 on v7x, 1 on v5e/v6e)."""
    try:
        info = pltpu.get_tpu_info()
        for attr in ("num_cores", "core_count", "num_tensorcores",
                     "tensorcores_per_chip"):
            n = getattr(info, attr, None)
            if isinstance(n, int) and n > 0:
                return n
    except Exception:
        pass
    try:
        kind = jax.devices()[0].device_kind.lower()
        if "v7" in kind or "tpu7" in kind:
            return 2
    except Exception:
        pass
    return 1


def _pick_batch_tile(B, S, num_cores, *, target_rows=256, max_unroll=16):
    """Pick Bt so Bt*S approaches the MXU M target, splitting the grid only
    when there are >= 2 TensorCores to feed (the grid is a sequential loop on a
    single TC, so splitting there is pure per-step overhead)."""
    bt = max(1, min(B, max(1, target_rows // max(S, 1)), max_unroll))
    while B % bt:
        bt -= 1
    if num_cores >= 2 and B >= num_cores and (B // bt) < num_cores:
        bt = max(1, B // num_cores)
        while B % bt:
            bt -= 1
    return bt


def _self_attention_kernel(x_ref, wq_ref, wk_ref, wv_ref,
                           bq_ref, bk_ref, bv_ref, o_ref, *,
                           batch_tile, seq):
    # x block: (Bt*S, E) — 2-D, no in-kernel reshape / relayout.
    xb = x_ref[...].astype(jnp.bfloat16)            # cast once

    # Projections: full Bt*S rows per MXU push; bf16 operands, f32 accumulate.
    # The 1/sqrt(E) scale is already folded into wq/bq by the wrapper.
    q = jnp.dot(xb, wq_ref[...], preferred_element_type=jnp.float32) + bq_ref[...]
    k = jnp.dot(xb, wk_ref[...], preferred_element_type=jnp.float32) + bk_ref[...]
    v = jnp.dot(xb, wv_ref[...], preferred_element_type=jnp.float32) + bv_ref[...]

    # Cast once for the attention matmuls (outside the per-example loop).
    qb = q.astype(jnp.bfloat16)
    kb = k.astype(jnp.bfloat16)
    vb = v.astype(jnp.bfloat16)

    # Per-example attention: static, sublane-tile-aligned slices (seq rows),
    # unrolled — batch_tile is small by construction.
    for b in range(batch_tile):
        lo = b * seq
        q_b = qb[lo:lo + seq, :]
        k_b = kb[lo:lo + seq, :]
        v_b = vb[lo:lo + seq, :]

        # scores = (q/sqrt(E)) @ k^T via contraction on E (no explicit k.T).
        s = lax.dot_general(q_b, k_b, (((1,), (1,)), ((), ())),
                            preferred_element_type=jnp.float32)   # (S, S) f32

        # Softmax over keys in f32; divide via approx reciprocal (EUP slot).
        m = jnp.max(s, axis=-1, keepdims=True)
        e = jnp.exp(s - m)
        denom = jnp.sum(e, axis=-1, keepdims=True)
        p = (e * pl.reciprocal(denom, approx=True)).astype(jnp.bfloat16)

        # O = P @ V : bf16 operands, f32 accumulate.
        o = jnp.dot(p, v_b, preferred_element_type=jnp.float32)   # (S, E) f32
        o_ref[lo:lo + seq, :] = o.astype(o_ref.dtype)


def self_attention(x, wq, wk, wv, bq, bk, bv, *, batch_tile=None, num_cores=None):
    """x: (B, S, E) f32; wq/wk/wv: (E, E) (stored (in,out)); bq/bk/bv: (1, E)."""
    B, S, E = x.shape

    if num_cores is None:
        num_cores = _num_tensorcores()
    if batch_tile is None:
        batch_tile = _pick_batch_tile(B, S, num_cores)
    assert B % batch_tile == 0
    grid = (B // batch_tile,)
    rows = batch_tile * S

    # One-time XLA-side prep (outside the kernel): fold the softmax scale into
    # the Q projection and pre-cast weights to bf16 (halves their DMA traffic).
    scale = 1.0 / math.sqrt(float(E))
    wq_b = (wq * scale).astype(jnp.bfloat16)
    bq_s = bq * scale
    wk_b = wk.astype(jnp.bfloat16)
    wv_b = wv.astype(jnp.bfloat16)

    # Free HBM reshape: the kernel works on lane-layout-friendly 2-D blocks.
    x2 = x.reshape(B * S, E)

    const = lambda i: (0, 0)          # constant index_map: DMA once, stays resident
    kernel = functools.partial(_self_attention_kernel,
                               batch_tile=batch_tile, seq=S)

    out2 = pl.pallas_call(
        kernel,
        out_shape=jax.ShapeDtypeStruct((B * S, E), x.dtype),
        grid_spec=pltpu.PrefetchScalarGridSpec(
            num_scalar_prefetch=0,
            grid=grid,
            in_specs=[
                pl.BlockSpec((rows, E), lambda i: (i, 0)),                      # x rows
                pl.BlockSpec((E, E), const, pipeline_mode=pl.Buffered(1)),      # Wq (scaled)
                pl.BlockSpec((E, E), const, pipeline_mode=pl.Buffered(1)),      # Wk
                pl.BlockSpec((E, E), const, pipeline_mode=pl.Buffered(1)),      # Wv
                pl.BlockSpec((1, E), const, pipeline_mode=pl.Buffered(1)),      # bq (scaled)
                pl.BlockSpec((1, E), const, pipeline_mode=pl.Buffered(1)),      # bk
                pl.BlockSpec((1, E), const, pipeline_mode=pl.Buffered(1)),      # bv
            ],
            out_specs=pl.BlockSpec((rows, E), lambda i: (i, 0)),
        ),
        compiler_params=pltpu.CompilerParams(
            dimension_semantics=("parallel",),
            vmem_limit_bytes=32 * 1024 * 1024,
        ),
    )(x2, wq_b, wk_b, wv_b, bq_s, bk, bv)

    return out2.reshape(B, S, E)


def self_attention_ref(x, wq, wk, wv, bq, bk, bv):
    """Pure-JAX f32 reference mirroring the torch module semantics."""
    E = x.shape[-1]
    q = x @ wq + bq
    k = x @ wk + bk
    v = x @ wv + bv
    scores = jnp.einsum("bqe,bke->bqk", q, k) / math.sqrt(float(E))
    weights = jax.nn.softmax(scores, axis=2)
    return jnp.einsum("bqk,bke->bqe", weights, v)


if __name__ == "__main__":
    key = jax.random.PRNGKey(0)
    B, S, E = 2, 8, 32   # batch, seq_length, embedding_dim

    k_x, k_wq, k_wk, k_wv, k_bq, k_bk, k_bv = jax.random.split(key, 7)
    x = jax.random.normal(k_x, (B, S, E), dtype=jnp.float32)

    # Deterministic synthetic parameters (nn.Linear(E, E) weights & biases),
    # stored directly in the transposed (in, out) layout.
    init_scale = 1.0 / math.sqrt(E)
    wq = jax.random.uniform(k_wq, (E, E), jnp.float32, -init_scale, init_scale)
    wk = jax.random.uniform(k_wk, (E, E), jnp.float32, -init_scale, init_scale)
    wv = jax.random.uniform(k_wv, (E, E), jnp.float32, -init_scale, init_scale)
    bq = jax.random.uniform(k_bq, (1, E), jnp.float32, -init_scale, init_scale)
    bk = jax.random.uniform(k_bk, (1, E), jnp.float32, -init_scale, init_scale)
    bv = jax.random.uniform(k_bv, (1, E), jnp.float32, -init_scale, init_scale)

    out = self_attention(x, wq, wk, wv, bq, bk, bv)
    out = jax.block_until_ready(out)

    ref = self_attention_ref(x, wq, wk, wv, bq, bk, bv)
    assert out.shape == (B, S, E)
    # Tolerance accounts for bf16 MXU operands (f32 accumulation) and the
    # approx-reciprocal softmax divide; error stays well under 3e-2 here.
    assert jnp.allclose(out, ref, atol=3e-2, rtol=3e-2), "mismatch vs reference"

    print("KERNEL_OK")
</pallas_src>

<mosaic_0001>
module attributes {stable_mosaic.version = 11 : i64} {
  func.func @_self_attention_kernel(%arg0: i32, %arg1: memref<16x32xf32, #tpu.memory_space<vmem>>, %arg2: memref<32x32xbf16, #tpu.memory_space<vmem>>, %arg3: memref<32x32xbf16, #tpu.memory_space<vmem>>, %arg4: memref<32x32xbf16, #tpu.memory_space<vmem>>, %arg5: memref<1x32xf32, #tpu.memory_space<vmem>>, %arg6: memref<1x32xf32, #tpu.memory_space<vmem>>, %arg7: memref<1x32xf32, #tpu.memory_space<vmem>>, %arg8: memref<16x32xf32, #tpu.memory_space<vmem>>) attributes {dimension_semantics = [#tpu.dimension_semantics<parallel>], iteration_bounds = array<i64: 1>, scalar_prefetch = 0 : i64, scratch_operands = 0 : i64, tpu.core_type = #tpu.core_type<tc>, window_params = [{transform_indices = @transform_0, window_bounds = array<i64: 16, 32>}, {pipeline_mode = #tpu.pipeline_mode<synchronous>, transform_indices = @transform_1, window_bounds = array<i64: 32, 32>}, {pipeline_mode = #tpu.pipeline_mode<synchronous>, transform_indices = @transform_2, window_bounds = array<i64: 32, 32>}, {pipeline_mode = #tpu.pipeline_mode<synchronous>, transform_indices = @transform_3, window_bounds = array<i64: 32, 32>}, {pipeline_mode = #tpu.pipeline_mode<synchronous>, transform_indices = @transform_4, window_bounds = array<i64: 1, 32>}, {pipeline_mode = #tpu.pipeline_mode<synchronous>, transform_indices = @transform_5, window_bounds = array<i64: 1, 32>}, {pipeline_mode = #tpu.pipeline_mode<synchronous>, transform_indices = @transform_6, window_bounds = array<i64: 1, 32>}, {transform_indices = @transform_7, window_bounds = array<i64: 16, 32>}]} {
    %c0 = arith.constant 0 : index
    %c0_0 = arith.constant 0 : index
    %0 = vector.load %arg1[%c0, %c0_0] : memref<16x32xf32, #tpu.memory_space<vmem>>, vector<16x32xf32>
    %1 = arith.truncf %0 : vector<16x32xf32> to vector<16x32xbf16>
    %c0_1 = arith.constant 0 : index
    %c0_2 = arith.constant 0 : index
    %2 = vector.load %arg2[%c0_1, %c0_2] : memref<32x32xbf16, #tpu.memory_space<vmem>>, vector<32x32xbf16>
    %cst = arith.constant dense<0.000000e+00> : vector<16x32xf32>
    %3 = tpu.matmul %1, %2, %cst {dimension_numbers = #tpu.dot_dimension_numbers<[1], [0], [0], [1], [0, 0, 1, 1], [], []>} : vector<16x32xbf16>, vector<32x32xbf16>, vector<16x32xf32> -> vector<16x32xf32>
    %c0_3 = arith.constant 0 : index
    %c0_4 = arith.constant 0 : index
    %4 = vector.load %arg5[%c0_3, %c0_4] : memref<1x32xf32, #tpu.memory_space<vmem>>, vector<1x32xf32>
    %5 = vector.broadcast %4 : vector<1x32xf32> to vector<16x32xf32>
    %6 = arith.addf %3, %5 : vector<16x32xf32>
    %c0_5 = arith.constant 0 : index
    %c0_6 = arith.constant 0 : index
    %7 = vector.load %arg3[%c0_5, %c0_6] : memref<32x32xbf16, #tpu.memory_space<vmem>>, vector<32x32xbf16>
    %cst_7 = arith.constant dense<0.000000e+00> : vector<16x32xf32>
    %8 = tpu.matmul %1, %7, %cst_7 {dimension_numbers = #tpu.dot_dimension_numbers<[1], [0], [0], [1], [0, 0, 1, 1], [], []>} : vector<16x32xbf16>, vector<32x32xbf16>, vector<16x32xf32> -> vector<16x32xf32>
    %c0_8 = arith.constant 0 : index
    %c0_9 = arith.constant 0 : index
    %9 = vector.load %arg6[%c0_8, %c0_9] : memref<1x32xf32, #tpu.memory_space<vmem>>, vector<1x32xf32>
    %10 = vector.broadcast %9 : vector<1x32xf32> to vector<16x32xf32>
    %11 = arith.addf %8, %10 : vector<16x32xf32>
    %c0_10 = arith.constant 0 : index
    %c0_11 = arith.constant 0 : index
    %12 = vector.load %arg4[%c0_10, %c0_11] : memref<32x32xbf16, #tpu.memory_space<vmem>>, vector<32x32xbf16>
    %cst_12 = arith.constant dense<0.000000e+00> : vector<16x32xf32>
    %13 = tpu.matmul %1, %12, %cst_12 {dimension_numbers = #tpu.dot_dimension_numbers<[1], [0], [0], [1], [0, 0, 1, 1], [], []>} : vector<16x32xbf16>, vector<32x32xbf16>, vector<16x32xf32> -> vector<16x32xf32>
    %c0_13 = arith.constant 0 : index
    %c0_14 = arith.constant 0 : index
    %14 = vector.load %arg7[%c0_13, %c0_14] : memref<1x32xf32, #tpu.memory_space<vmem>>, vector<1x32xf32>
    %15 = vector.broadcast %14 : vector<1x32xf32> to vector<16x32xf32>
    %16 = arith.addf %13, %15 : vector<16x32xf32>
    %17 = arith.truncf %6 : vector<16x32xf32> to vector<16x32xbf16>
    %18 = arith.truncf %11 : vector<16x32xf32> to vector<16x32xbf16>
    %19 = arith.truncf %16 : vector<16x32xf32> to vector<16x32xbf16>
    %20 = vector.extract_strided_slice %17 {offsets = [0, 0], sizes = [8, 32], strides = [1, 1]} : vector<16x32xbf16> to vector<8x32xbf16>
    %21 = vector.extract_strided_slice %18 {offsets = [0, 0], sizes = [8, 32], strides = [1, 1]} : vector<16x32xbf16> to vector<8x32xbf16>
    %22 = vector.extract_strided_slice %19 {offsets = [0, 0], sizes = [8, 32], strides = [1, 1]} : vector<16x32xbf16> to vector<8x32xbf16>
    %cst_15 = arith.constant dense<0.000000e+00> : vector<8x8xf32>
    %23 = tpu.matmul %20, %21, %cst_15 {dimension_numbers = #tpu.dot_dimension_numbers<[1], [1], [0], [0], [0, 0, 1, 0], [], []>} : vector<8x32xbf16>, vector<8x32xbf16>, vector<8x8xf32> -> vector<8x8xf32>
    %cst_16 = arith.constant dense<0xFF800000> : vector<8xf32>
    %24 = vector.multi_reduction <maximumf>, %23, %cst_16 [1] : vector<8x8xf32> to vector<8xf32>
    %25 = vector.shape_cast %24 : vector<8xf32> to vector<8x1xf32>
    %26 = vector.broadcast %25 : vector<8x1xf32> to vector<8x8xf32>
    %27 = arith.subf %23, %26 : vector<8x8xf32>
    %28 = math.exp %27 : vector<8x8xf32>
    %cst_17 = arith.constant dense<0.000000e+00> : vector<8xf32>
    %29 = vector.multi_reduction <add>, %28, %cst_17 [1] : vector<8x8xf32> to vector<8xf32>
    %30 = vector.shape_cast %29 : vector<8xf32> to vector<8x1xf32>
    %31 = tpu.reciprocal %30 {approx = true} : vector<8x1xf32> -> vector<8x1xf32>
    %32 = vector.broadcast %31 : vector<8x1xf32> to vector<8x8xf32>
    %33 = arith.mulf %28, %32 : vector<8x8xf32>
    %34 = arith.truncf %33 : vector<8x8xf32> to vector<8x8xbf16>
    %cst_18 = arith.constant dense<0.000000e+00> : vector<8x32xf32>
    %35 = tpu.matmul %34, %22, %cst_18 {dimension_numbers = #tpu.dot_dimension_numbers<[1], [0], [0], [1], [0, 0, 1, 1], [], []>} : vector<8x8xbf16>, vector<8x32xbf16>, vector<8x32xf32> -> vector<8x32xf32>
    %c0_19 = arith.constant 0 : index
    %c0_20 = arith.constant 0 : index
    %36 = vector.load %arg8[%c0_19, %c0_20] : memref<16x32xf32, #tpu.memory_space<vmem>>, vector<8x32xf32>
    tpu.vector_store %arg8[%c0_19, %c0_20], %35 {strides = array<i32>} : memref<16x32xf32, #tpu.memory_space<vmem>>, vector<8x32xf32>,
    %37 = vector.extract_strided_slice %17 {offsets = [8, 0], sizes = [8, 32], strides = [1, 1]} : vector<16x32xbf16> to vector<8x32xbf16>
    %38 = vector.extract_strided_slice %18 {offsets = [8, 0], sizes = [8, 32], strides = [1, 1]} : vector<16x32xbf16> to vector<8x32xbf16>
    %39 = vector.extract_strided_slice %19 {offsets = [8, 0], sizes = [8, 32], strides = [1, 1]} : vector<16x32xbf16> to vector<8x32xbf16>
    %cst_21 = arith.constant dense<0.000000e+00> : vector<8x8xf32>
    %40 = tpu.matmul %37, %38, %cst_21 {dimension_numbers = #tpu.dot_dimension_numbers<[1], [1], [0], [0], [0, 0, 1, 0], [], []>} : vector<8x32xbf16>, vector<8x32xbf16>, vector<8x8xf32> -> vector<8x8xf32>
    %cst_22 = arith.constant dense<0xFF800000> : vector<8xf32>
    %41 = vector.multi_reduction <maximumf>, %40, %cst_22 [1] : vector<8x8xf32> to vector<8xf32>
    %42 = vector.shape_cast %41 : vector<8xf32> to vector<8x1xf32>
    %43 = vector.broadcast %42 : vector<8x1xf32> to vector<8x8xf32>
    %44 = arith.subf %40, %43 : vector<8x8xf32>
    %45 = math.exp %44 : vector<8x8xf32>
    %cst_23 = arith.constant dense<0.000000e+00> : vector<8xf32>
    %46 = vector.multi_reduction <add>, %45, %cst_23 [1] : vector<8x8xf32> to vector<8xf32>
    %47 = vector.shape_cast %46 : vector<8xf32> to vector<8x1xf32>
    %48 = tpu.reciprocal %47 {approx = true} : vector<8x1xf32> -> vector<8x1xf32>
    %49 = vector.broadcast %48 : vector<8x1xf32> to vector<8x8xf32>
    %50 = arith.mulf %45, %49 : vector<8x8xf32>
    %51 = arith.truncf %50 : vector<8x8xf32> to vector<8x8xbf16>
    %cst_24 = arith.constant dense<0.000000e+00> : vector<8x32xf32>
    %52 = tpu.matmul %51, %39, %cst_24 {dimension_numbers = #tpu.dot_dimension_numbers<[1], [0], [0], [1], [0, 0, 1, 1], [], []>} : vector<8x8xbf16>, vector<8x32xbf16>, vector<8x32xf32> -> vector<8x32xf32>
    %c8 = arith.constant 8 : index
    %c0_25 = arith.constant 0 : index
    %53 = vector.load %arg8[%c8, %c0_25] : memref<16x32xf32, #tpu.memory_space<vmem>>, vector<8x32xf32>
    tpu.vector_store %arg8[%c8, %c0_25], %52 {strides = array<i32>} : memref<16x32xf32, #tpu.memory_space<vmem>>, vector<8x32xf32>,
    return
  }
  func.func @transform_0(%arg0: i32) -> (i32, i32) {
    %c0_i32 = arith.constant 0 : i32
    %c0_i32_0 = arith.constant 0 : i32
    return %arg0, %c0_i32 : i32, i32
  }
  func.func @transform_1(%arg0: i32) -> (i32, i32) {
    %c0_i32 = arith.constant 0 : i32
    %c0_i32_0 = arith.constant 0 : i32
    %c0_i32_1 = arith.constant 0 : i32
    return %c0_i32, %c0_i32_0 : i32, i32
  }
  func.func @transform_2(%arg0: i32) -> (i32, i32) {
    %c0_i32 = arith.constant 0 : i32
    %c0_i32_0 = arith.constant 0 : i32
    %c0_i32_1 = arith.constant 0 : i32
    return %c0_i32, %c0_i32_0 : i32, i32
  }
  func.func @transform_3(%arg0: i32) -> (i32, i32) {
    %c0_i32 = arith.constant 0 : i32
    %c0_i32_0 = arith.constant 0 : i32
    %c0_i32_1 = arith.constant 0 : i32
    return %c0_i32, %c0_i32_0 : i32, i32
  }
  func.func @transform_4(%arg0: i32) -> (i32, i32) {
    %c0_i32 = arith.constant 0 : i32
    %c0_i32_0 = arith.constant 0 : i32
    %c0_i32_1 = arith.constant 0 : i32
    return %c0_i32, %c0_i32_0 : i32, i32
  }
  func.func @transform_5(%arg0: i32) -> (i32, i32) {
    %c0_i32 = arith.constant 0 : i32
    %c0_i32_0 = arith.constant 0 : i32
    %c0_i32_1 = arith.constant 0 : i32
    return %c0_i32, %c0_i32_0 : i32, i32
  }
  func.func @transform_6(%arg0: i32) -> (i32, i32) {
    %c0_i32 = arith.constant 0 : i32
    %c0_i32_0 = arith.constant 0 : i32
    %c0_i32_1 = arith.constant 0 : i32
    return %c0_i32, %c0_i32_0 : i32, i32
  }
  func.func @transform_7(%arg0: i32) -> (i32, i32) {
    %c0_i32 = arith.constant 0 : i32
    %c0_i32_0 = arith.constant 0 : i32
    return %arg0, %c0_i32 : i32, i32
  }
}

</mosaic_0001>

<bundles_post_ra>
// kernel: tpu_custom_call.1
= control target key start
LH: loop header
LB: loop body
LE: loop exit
PB: predicated region body
PF: predicated region fallthrough
CT: control target
= control target key end

     0   :  { %12 = vsyncpa [#allocation3], 0  ;;  %s610_s0 = inlined_call_operand.hbm [shape: f32[16,32], index: 0, kind: input, shape index: {}]   ;;  %s611_s1 = inlined_call_operand.hbm [shape: bf16[32,32], index: 1, kind: input, shape index: {}]   ;;  %s612_s2 = inlined_call_operand.hbm [shape: bf16[32,32], index: 2, kind: input, shape index: {}]   ;;  %s613_s3 = inlined_call_operand.hbm [shape: bf16[32,32], index: 3, kind: input, shape index: {}]   ;;  %s614_s4 = inlined_call_operand.vmem [shape: f32[1,32], index: 4, kind: input, shape index: {}]   ;;  %s615_s5 = inlined_call_operand.vmem [shape: f32[1,32], index: 5, kind: input, shape index: {}]   ;;  %s616_s6 = inlined_call_operand.vmem [shape: f32[1,32], index: 6, kind: input, shape index: {}]   ;;  %s617_s7 = inlined_call_operand.hbm [shape: f32[16,32], index: 7, kind: output, shape index: {}]  }
   0x1   :  { %13 = vsyncpa [#allocation6], 0 }
   0x2   :  { %14 = vsyncpa [#allocation9], 0  ;;  %s33_s26 = sshll.u32 %s611_s1, 4  ;;  %s34_s26 = int_to_ptr.hbm [resolvable:$true] %s33_s26 }
   0x3   :  { %15 = vsyncpa [#allocation4], 0  ;;  %s516_s27 = smov [#allocation5]   ;;  %s20_s8 = sshll.u32 %s610_s0, 4  ;;  %s21_s8 = int_to_ptr.hbm [resolvable:$true] %s20_s8 }
   0x4   :  { %s35_s28 = sshll.u32 %s516_s27, 4  ;;  %s517_s9 = smov 64   ;;  %s36_s28 = int_to_ptr.vmem [resolvable:$true] %s35_s28 }
   0x5   :  { %s518_s10 = smov 4   ;;  %s519_s11 = smov [#allocation2]  }
   0x6   :  { %41 = dma.hbm_to_vmem [thread:$0]  %s34_s26, 256, %s36_s28, [#allocation6], %s517_s9, %s517_s9, %s518_s10  }
   0x7   :  { %s22_s12 = sshll.u32 %s519_s11, 4  ;;  %s520_s13 = smov 128   ;;  %s23_s12 = int_to_ptr.vmem [resolvable:$true] %s22_s12 }
   0x8   :  { %s521_s14 = smov 8   ;;  %s46_s16 = sshll.u32 %s612_s2, 4  ;;  %s47_s16 = int_to_ptr.hbm [resolvable:$true] %s46_s16 }
   0x9   :  { %28 = dma.hbm_to_vmem [thread:$0]  %s21_s8, 256, %s23_s12, [#allocation3], %s520_s13, %s520_s13, %s521_s14  }
   0xa   :  { %s522_s17 = smov [#allocation7]   ;;  %s59_s20 = sshll.u32 %s613_s3, 4  ;;  %s60_s20 = int_to_ptr.hbm [resolvable:$true] %s59_s20 }
   0xb   :  { %s48_s0 = sshll.u32 %s522_s17, 4  ;;  %s523_s21 = smov [#allocation8]   ;;  %s49_s0 = int_to_ptr.vmem [resolvable:$true] %s48_s0 }
   0xc   :  { %54 = dma.hbm_to_vmem [thread:$0]  %s47_s16, 256, %s49_s0, [#allocation6], %s517_s9, %s517_s9, %s518_s10  }
   0xd   :  { %s61_s22 = sshll.u32 %s523_s21, 4  ;;  %s62_s22 = int_to_ptr.vmem [resolvable:$true] %s61_s22 }
   0xe   :  { %67 = dma.hbm_to_vmem [thread:$0]  %s60_s20, 256, %s62_s22, [#allocation9], %s517_s9, %s517_s9, %s518_s10  }
   0xf   :  { %508 = dma.done.wait [#allocation3], 256  }
  0x10   :  { %509 = vsyncadd [#allocation3], 4294967040 }
  0x11   :  { %510 = dma.done.wait [#allocation6], 512  }
  0x12   :  { %511 = vsyncadd [#allocation6], 4294966784 }
  0x13   :  { %512 = dma.done.wait [#allocation9], 256  }
  0x14   :  { %513 = vsyncadd [#allocation9], 4294967040  ;;  %v365_v0 = vld [vmem:[#allocation7 + $0x8] sm:$0xff]  ;;  %v364_v1 = vld [vmem:[#allocation7] sm:$0xff]  ;;  %vm114_vm0 = vcmask 261120   ;;  %vm225_vm1 = vcmask 64512  }
  0x15   :  { %v91_v2 = vld [vmem:[#allocation2] sm:$0xff]  ;;  %v363_v3 = vld [vmem:[#allocation5 + $0x8] sm:$0xff]  ;;  %158 = vmatpush.bf16.msra.mxu1 %v365_v0  ;;  %v92_v4 = vld [vmem:[#allocation2 + $0x8] sm:$0xff]  ;;  %vm241_vm2 = vcmask 1043456   ;;  %s316_s28 = sshll.u32 %s617_s7, 4  ;;  %s317_s28 = int_to_ptr.hbm [resolvable:$true] %s316_s28 }
  0x16   :  { %124 = vmatpush.bf16.msra.mxu0 %v363_v3  ;;  %v362_v5 = vld [vmem:[#allocation5] sm:$0xff]  ;;  %v93_v6 = vpack.c.bf16 %v92_v4, %v91_v2  ;;  %v377_v7 = vld [vmem:[%s615_s5] ss:$0 sm:$0xff]  ;;  %v367_v23 = vld [vmem:[#allocation8 + $0x8] sm:$0xff] }
  0x17   :  { %v378_v10 = vld [vmem:[%s614_s4] ss:$0 sm:$0xff]  ;;  %192 = vmatpush.bf16.msra.mxu2 %v367_v23  ;;  %v366_v24 = vld [vmem:[#allocation8] sm:$0xff] }
  0x18   :  { %v379_v31 = vld [vmem:[%s616_s6] ss:$0 sm:$0xff]  ;;  %s524_s6 = smov [#allocation10]  }
  0x19   :  { %159 = vmatpush.bf16.msra.mxu1 %v364_v1  ;;  %s314_s25 = sshll.u32 %s524_s6, 4  ;;  %s315_s25 = int_to_ptr.vmem [resolvable:$true] %s314_s25 }
  0x1a   :  { %125 = vmatpush.bf16.msra.mxu0 %v362_v5 }
  0x1b   :  { %193 = vmatpush.bf16.msra.mxu2 %v366_v24 }
  0x1c   :  { %348 = vmatmul.msk.bf16.vlgmr.msra.gmra.mxu1 %vm114_vm0, %v93_v6 }
  0x1d   :  { %339 = vmatmul.msk.bf16.vlgmr.msra.gmra.mxu0 %vm114_vm0, %v93_v6 }
  0x1e   :  { %357 = vmatmul.msk.bf16.vlgmr.msra.gmra.mxu2 %vm114_vm0, %v93_v6 }
  0x99   :  { %v161_v8 = vpop.f32.mrf.mxu1 }
  0x9a   :  { %v162_v9 = vadd.f32 %v377_v7, %v161_v8  ;;  %v127_v11 = vpop.f32.mrf.mxu0 }
  0x9b   :  { %v128_v14 = vadd.f32 %v378_v10, %v127_v11 }
  0x9c   :  { %v202_v12 = vpack.c.bf16 %v162_v9, %v162_v9 }
  0x9d   :  { %v200_v16 = vpack.c.bf16 %v128_v14, %v128_v14 }
  0x9e   :  { %v210_v13 = vsel %vm114_vm0, %v202_v12, 0 }
  0x9f   :  { %219 = vmatpush.bf16.xpose.msra.mxu3 %v210_v13 }
  0xa1   :  { %v163_v15 = vpop.f32.mrf.mxu1  ;;  %v195_v34 = vpop.f32.mrf.mxu2 }
  0xa2   :  { %v164_v17 = vadd.f32 %v377_v7, %v163_v15  ;;  %v129_v19 = vpop.f32.mrf.mxu0  ;;  %v196_v35 = vadd.f32 %v379_v31, %v195_v34 }
  0xa3   :  { %v130_v21 = vadd.f32 %v378_v10, %v129_v19 }
  0xa4   :  { %v203_v18 = vpack.c.bf16 %v164_v17, %v164_v17  ;;  %v204_v37 = vpack.c.bf16 %v196_v35, %v196_v35 }
  0xa5   :  { %v201_v22 = vpack.c.bf16 %v130_v21, %v130_v21 }
  0xa6   :  { %358 = vmatmul.msk.bf16.vlgmr.msra.gmra.mxu3 %vm114_vm0, %v200_v16  ;;  %v263_v20 = vsel %vm114_vm0, %v203_v18, 0  ;;  %v243_v38 = vsel %vm241_vm2, %v204_v37, 0 }
  0xa7   :  { %272 = vmatpush.bf16.xpose.msrb.mxu1 %v263_v20  ;;  %252 = vmatpush.bf16.msrb.mxu0 %v243_v38 }
  0xa9   :  { %v197_v41 = vpop.f32.mrf.mxu2 }
  0xaa   :  { %v198_v42 = vadd.f32 %v379_v31, %v197_v41 }
  0xac   :  { %v205_v46 = vpack.c.bf16 %v198_v42, %v198_v42 }
  0xae   :  { %360 = vmatmul.msk.bf16.vlgmr.msrb.gmra.mxu1 %vm114_vm0, %v201_v22  ;;  %v294_v47 = vsel %vm241_vm2, %v205_v46, 0 }
  0xaf   :  { %303 = vmatpush.bf16.msrb.mxu2 %v294_v47 }
 0x129   :  { %v221_v25 = vpop.f32.mrf.mxu3 }
 0x12a   :  { %v226_v30 = vsel %vm225_vm1, %v221_v25, -inf }
 0x12b   :  { %v274_v26 = vpop.f32.mrf.mxu1 }
 0x12c   :  { %v278_v27 = vsel %vm225_vm1, %v274_v26, -inf }
 0x12d   :  { %279 = vmax.xlane.f32.xlu0 %v278_v27 }
 0x131   :  { %v223_v28 = vpop.f32.mrf.mxu3 }
 0x133   :  { %v276_v29 = vpop.f32.mrf.mxu1 }
 0x135   :  { %227 = vmax.xlane.f32.xlu0 %v226_v30 }
 0x1a0   :  { %v280_v32 = vpop.xlane.xlu0 %279 }
 0x1a1   :  { %v281_v33 = vsub.f32 %v274_v26, %v280_v32 }
 0x1a3   :  { %v282_v36 = vmul.f32 1.442695, %v281_v33 }
 0x1a5   :  { %380 = vpow2.f32 %v282_v36 }
 0x1a8   :  { %v228_v39 = vpop.xlane.xlu0 %227 }
 0x1a9   :  { %v229_v40 = vsub.f32 %v221_v25, %v228_v39 }
 0x1ab   :  { %v381_v43 = vpop.eup %380  ;;  %v230_v44 = vmul.f32 1.442695, %v229_v40 }
 0x1ac   :  { %v284_v45 = vsel %vm225_vm1, %v381_v43, 0.0 }
 0x1ad   :  { %382 = vpow2.f32 %v230_v44  ;;  %285 = vadd.xlane.f32.xlu1 %v284_v45 }
 0x1b3   :  { %v383_v48 = vpop.eup %382 }
 0x1b4   :  { %v232_v49 = vsel %vm225_vm1, %v383_v48, 0.0 }
 0x1b5   :  { %233 = vadd.xlane.f32.xlu1 %v232_v49 }
 0x220   :  { %v286_v50 = vpop.xlane.xlu1 %285 }
 0x221   :  { %384 = vrcp.f32 %v286_v50 }
 0x227   :  { %v385_v51 = vpop.eup %384 }
 0x228   :  { %v288_v52 = vmul.f32 %v385_v51, %v381_v43  ;;  %v234_v53 = vpop.xlane.xlu1 %233 }
 0x229   :  { %386 = vrcp.f32 %v234_v53 }
 0x22a   :  { %v289_v54 = vpack.c.bf16 %v288_v52, %v288_v52 }
 0x22c   :  { %361 = vmatmul.msk.bf16.vlgmr.msrb.gmra.mxu2 %vm225_vm1, %v289_v54 }
 0x22f   :  { %v387_v55 = vpop.eup %386 }
 0x230   :  { %v236_v56 = vmul.f32 %v387_v55, %v383_v48 }
 0x232   :  { %v237_v57 = vpack.c.bf16 %v236_v56, %v236_v56 }
 0x234   :  { %359 = vmatmul.msk.bf16.vlgmr.msrb.gmra.mxu0 %vm225_vm1, %v237_v57 }
 0x2af   :  { %v305_v58 = vpop.f32.mrf.mxu2 }
 0x2b0   :  { %309 = vst.msk [vmem:[#allocation10 + $0x8] sm:$0xff] %vm114_vm0, %v305_v58 }
 0x2b1   :  { %v254_v59 = vpop.f32.mrf.mxu0 }
 0x2b2   :  { %258 = vst.msk [vmem:[#allocation10] sm:$0xff] %vm114_vm0, %v254_v59 }
 0x2b3   :  { %322 = dma.vmem_to_hbm [thread:$0]  %s315_s25, 256, %s317_s28, [#allocation4], %s520_s13, %s520_s13, %s521_s14  }
 0x2b7   :  { %v307_v60 = vpop.f32.mrf.mxu2 }
 0x2b9   :  { %v256_v61 = vpop.f32.mrf.mxu0 }
 0x2ba   :  { %514 = dma.done.wait [#allocation4], 256  }
 0x2bb   :  { %515 = vsyncadd [#allocation4], 4294967040 }
 0x2bc   :  { %327 = vsyncpa [#allocation3], 1 }
 0x2bd   :  { %328 = vsyncpa [#allocation6], 1 }
 0x2be   :  { %329 = vsyncpa [#allocation9], 1 }
 0x2bf   :  { %330 = vsyncpa [#allocation4], 1 }

</bundles_post_ra>
